<compile_context>
chip_gen: v7x
topology: tpu7x:2x2x1
jax: 0.10.0
libtpu: 0.0.40
codegen_flags: <defaults>
</compile_context>

<pallas_src>
import functools

import jax
import jax.numpy as jnp
from jax.experimental import pallas as pl
from jax.experimental.pallas import tpu as pltpu


_VMEM = pl.BlockSpec(memory_space=pltpu.MemorySpace.VMEM)


# ----------------------------------------------------------------------------
# Fused kernel: num_layers LSTM cell steps + Linear head, one pallas_call.
# ----------------------------------------------------------------------------
def _make_decoder_kernel(num_layers):
    def kernel(*refs):
        # inputs : x, h, c, (w_cat_l, bias_l) * num_layers, lin_w_t, lin_b
        # outputs: pred, h_out, c_out
        x_ref, h_ref, c_ref = refs[0], refs[1], refs[2]
        layer_refs = refs[3:3 + 2 * num_layers]
        lin_w_ref = refs[3 + 2 * num_layers]
        lin_b_ref = refs[4 + 2 * num_layers]
        pred_ref = refs[5 + 2 * num_layers]
        h_out_ref = refs[6 + 2 * num_layers]
        c_out_ref = refs[7 + 2 * num_layers]

        H = h_ref.shape[2]
        x = x_ref[...].astype(jnp.float32)

        for layer in range(num_layers):
            w_cat = layer_refs[2 * layer][...]       # (in_dim + H, 4H)
            bias = layer_refs[2 * layer + 1][...]    # (1, 4H) = b_ih + b_hh
            h_prev = h_ref[layer].astype(jnp.float32)  # (B, H)
            c_prev = c_ref[layer].astype(jnp.float32)  # (B, H)

            # Single MXU pass per layer: [x, h] @ [W_ih; W_hh] + b
            xh = jnp.concatenate([x, h_prev], axis=-1)       # (B, in_dim + H)
            gates = jnp.dot(xh, w_cat,
                            preferred_element_type=jnp.float32) + bias

            # Dense full-vreg EUP passes, then cheap lane slices.
            sig = jax.nn.sigmoid(gates)  # holds i, f, o gates
            tnh = jnp.tanh(gates)        # holds g gate
            i_g = sig[:, 0 * H:1 * H]
            f_g = sig[:, 1 * H:2 * H]
            g_g = tnh[:, 2 * H:3 * H]
            o_g = sig[:, 3 * H:4 * H]

            c_new = f_g * c_prev + i_g * g_g
            h_new = o_g * jnp.tanh(c_new)

            h_out_ref[layer] = h_new.astype(h_out_ref.dtype)
            c_out_ref[layer] = c_new.astype(c_out_ref.dtype)
            x = h_new  # feeds the next layer

        # Linear head (hidden_size -> input_size), fused into the same kernel.
        pred_ref[...] = (
            jnp.dot(x, lin_w_ref[...], preferred_element_type=jnp.float32)
            + lin_b_ref[...]
        ).astype(pred_ref.dtype)

    return kernel


# ----------------------------------------------------------------------------
# Wrapper
# ----------------------------------------------------------------------------
@functools.partial(jax.jit, static_argnames=("num_layers",))
def decoder_forward(packed, input_seq, h, c, *, num_layers):
    """Mirrors Decoder.forward: returns (pred, h_new, c_new)."""
    B = input_seq.shape[0]
    L, _, H = h.shape
    O = packed["linear_w_t"].shape[1]

    layer_args = []
    for w_cat, b in packed["lstm"]:
        layer_args += [w_cat, b]

    n_inputs = 3 + len(layer_args) + 2
    kernel = _make_decoder_kernel(num_layers)

    pred, h_new, c_new = pl.pallas_call(
        kernel,
        out_shape=(jax.ShapeDtypeStruct((B, O), input_seq.dtype),
                   jax.ShapeDtypeStruct((L, B, H), h.dtype),
                   jax.ShapeDtypeStruct((L, B, H), c.dtype)),
        in_specs=[_VMEM] * n_inputs,
        out_specs=(_VMEM, _VMEM, _VMEM),
        # h -> h_out, c -> c_out updated in place (no fresh HBM allocations).
        input_output_aliases={1: 1, 2: 2},
    )(input_seq, h, c, *layer_args,
      packed["linear_w_t"], packed["linear_b"])
    return pred, h_new, c_new


# ----------------------------------------------------------------------------
# Parameters: raw torch-shaped weights + packing for the kernel.
# ----------------------------------------------------------------------------
def init_raw_params(key, input_size, hidden_size, num_layers,
                    dtype=jnp.float32):
    """Synthetic parameters with nn.LSTM / nn.Linear shapes (torch layout)."""
    raw = {"lstm": []}
    k = key
    scale = 1.0 / jnp.sqrt(hidden_size)
    for layer in range(num_layers):
        in_dim = input_size if layer == 0 else hidden_size
        k, k1, k2, k3, k4 = jax.random.split(k, 5)
        w_ih = jax.random.uniform(k1, (4 * hidden_size, in_dim), dtype,
                                  -scale, scale)
        w_hh = jax.random.uniform(k2, (4 * hidden_size, hidden_size), dtype,
                                  -scale, scale)
        b_ih = jax.random.uniform(k3, (4 * hidden_size,), dtype, -scale, scale)
        b_hh = jax.random.uniform(k4, (4 * hidden_size,), dtype, -scale, scale)
        raw["lstm"].append((w_ih, w_hh, b_ih, b_hh))
    k, k1, k2 = jax.random.split(k, 3)
    lin_w = jax.random.uniform(k1, (input_size, hidden_size), dtype,
                               -scale, scale)
    lin_b = jax.random.uniform(k2, (input_size,), dtype, -scale, scale)
    raw["linear"] = (lin_w, lin_b)
    return raw


def pack_params(raw):
    """Pack torch-shaped weights for the kernel: W_cat = [W_ih; W_hh]^T-style."""
    packed = {"lstm": []}
    for w_ih, w_hh, b_ih, b_hh in raw["lstm"]:
        # (in_dim + H, 4H) so the kernel does concat([x, h]) @ W_cat once.
        w_cat = jnp.concatenate([w_ih.T, w_hh.T], axis=0)
        packed["lstm"].append((w_cat, (b_ih + b_hh)[None, :]))
    lin_w, lin_b = raw["linear"]
    packed["linear_w_t"] = lin_w.T
    packed["linear_b"] = lin_b[None, :]
    return packed


# ----------------------------------------------------------------------------
# Pure-JAX reference from the RAW (torch-layout) weights.
# ----------------------------------------------------------------------------
def decoder_reference(raw, x, h, c, num_layers):
    H = h.shape[2]
    h_outs, c_outs = [], []
    for layer in range(num_layers):
        w_ih, w_hh, b_ih, b_hh = raw["lstm"][layer]
        gates = x @ w_ih.T + h[layer] @ w_hh.T + b_ih + b_hh
        i = jax.nn.sigmoid(gates[:, 0 * H:1 * H])
        f = jax.nn.sigmoid(gates[:, 1 * H:2 * H])
        g = jnp.tanh(gates[:, 2 * H:3 * H])
        o = jax.nn.sigmoid(gates[:, 3 * H:4 * H])
        c_new = f * c[layer] + i * g
        h_new = o * jnp.tanh(c_new)
        h_outs.append(h_new)
        c_outs.append(c_new)
        x = h_new
    lin_w, lin_b = raw["linear"]
    pred = x @ lin_w.T + lin_b
    return pred, jnp.stack(h_outs), jnp.stack(c_outs)


if __name__ == "__main__":
    batch_size = 2
    input_size = 8
    hidden_size = 32
    num_layers = 2

    key = jax.random.PRNGKey(0)
    kp, kx, kh, kc = jax.random.split(key, 4)

    raw = init_raw_params(kp, input_size, hidden_size, num_layers)
    packed = pack_params(raw)

    input_seq = jax.random.normal(kx, (batch_size, input_size), jnp.float32)
    h0 = jax.random.normal(kh, (num_layers, batch_size, hidden_size),
                           jnp.float32)
    c0 = jax.random.normal(kc, (num_layers, batch_size, hidden_size),
                           jnp.float32)

    pred, h1, c1 = decoder_forward(packed, input_seq, h0, c0,
                                   num_layers=num_layers)
    jax.block_until_ready((pred, h1, c1))

    # Correctness check against the torch-semantics reference.
    pred_r, h1_r, c1_r = decoder_reference(raw, input_seq, h0, c0, num_layers)
    assert jnp.allclose(pred, pred_r, atol=1e-5, rtol=1e-5)
    assert jnp.allclose(h1, h1_r, atol=1e-5, rtol=1e-5)
    assert jnp.allclose(c1, c1_r, atol=1e-5, rtol=1e-5)

    print("KERNEL_OK")
</pallas_src>

<mosaic_0001>
module attributes {stable_mosaic.version = 11 : i64} {
  func.func @kernel(%arg0: memref<2x8xf32, #tpu.memory_space<vmem>>, %arg1: memref<2x2x32xf32, #tpu.memory_space<vmem>>, %arg2: memref<2x2x32xf32, #tpu.memory_space<vmem>>, %arg3: memref<40x128xf32, #tpu.memory_space<vmem>>, %arg4: memref<1x128xf32, #tpu.memory_space<vmem>>, %arg5: memref<64x128xf32, #tpu.memory_space<vmem>>, %arg6: memref<1x128xf32, #tpu.memory_space<vmem>>, %arg7: memref<32x8xf32, #tpu.memory_space<vmem>>, %arg8: memref<1x8xf32, #tpu.memory_space<vmem>>, %arg9: memref<2x8xf32, #tpu.memory_space<vmem>>, %arg10: memref<2x2x32xf32, #tpu.memory_space<vmem>>, %arg11: memref<2x2x32xf32, #tpu.memory_space<vmem>>) attributes {dimension_semantics = [], scalar_prefetch = 0 : i64, scratch_operands = 0 : i64, tpu.core_type = #tpu.core_type<tc>} {
    %c0 = arith.constant 0 : index
    %c0_0 = arith.constant 0 : index
    %0 = vector.load %arg0[%c0, %c0_0] : memref<2x8xf32, #tpu.memory_space<vmem>>, vector<2x8xf32>
    %c0_1 = arith.constant 0 : index
    %c0_2 = arith.constant 0 : index
    %1 = vector.load %arg3[%c0_1, %c0_2] : memref<40x128xf32, #tpu.memory_space<vmem>>, vector<40x128xf32>
    %c0_3 = arith.constant 0 : index
    %c0_4 = arith.constant 0 : index
    %2 = vector.load %arg4[%c0_3, %c0_4] : memref<1x128xf32, #tpu.memory_space<vmem>>, vector<1x128xf32>
    %c0_5 = arith.constant 0 : index
    %c0_6 = arith.constant 0 : index
    %c0_7 = arith.constant 0 : index
    %3 = vector.load %arg1[%c0_5, %c0_6, %c0_7] : memref<2x2x32xf32, #tpu.memory_space<vmem>>, vector<1x2x32xf32>
    %4 = vector.shape_cast %3 : vector<1x2x32xf32> to vector<2x32xf32>
    %c0_8 = arith.constant 0 : index
    %c0_9 = arith.constant 0 : index
    %c0_10 = arith.constant 0 : index
    %5 = vector.load %arg2[%c0_8, %c0_9, %c0_10] : memref<2x2x32xf32, #tpu.memory_space<vmem>>, vector<1x2x32xf32>
    %6 = vector.shape_cast %5 : vector<1x2x32xf32> to vector<2x32xf32>
    %7 = tpu.concatenate %0, %4 in 1 : vector<2x8xf32>, vector<2x32xf32> -> vector<2x40xf32>
    %cst = arith.constant dense<0.000000e+00> : vector<2x128xf32>
    %8 = tpu.matmul %7, %1, %cst {dimension_numbers = #tpu.dot_dimension_numbers<[1], [0], [0], [1], [0, 0, 1, 1], [], []>} : vector<2x40xf32>, vector<40x128xf32>, vector<2x128xf32> -> vector<2x128xf32>
    %9 = vector.broadcast %2 : vector<1x128xf32> to vector<2x128xf32>
    %10 = arith.addf %8, %9 : vector<2x128xf32>
    %11 = arith.negf %10 : vector<2x128xf32>
    %12 = math.exp %11 : vector<2x128xf32>
    %cst_11 = arith.constant 1.000000e+00 : f32
    %13 = vector.broadcast %cst_11 : f32 to vector<2x128xf32>
    %14 = arith.addf %13, %12 : vector<2x128xf32>
    %15 = arith.divf %13, %14 : vector<2x128xf32>
    %16 = math.tanh %10 : vector<2x128xf32>
    %17 = vector.extract_strided_slice %15 {offsets = [0, 0], sizes = [2, 32], strides = [1, 1]} : vector<2x128xf32> to vector<2x32xf32>
    %18 = vector.extract_strided_slice %15 {offsets = [0, 32], sizes = [2, 32], strides = [1, 1]} : vector<2x128xf32> to vector<2x32xf32>
    %19 = vector.extract_strided_slice %16 {offsets = [0, 64], sizes = [2, 32], strides = [1, 1]} : vector<2x128xf32> to vector<2x32xf32>
    %20 = vector.extract_strided_slice %15 {offsets = [0, 96], sizes = [2, 32], strides = [1, 1]} : vector<2x128xf32> to vector<2x32xf32>
    %21 = arith.mulf %18, %6 : vector<2x32xf32>
    %22 = arith.mulf %17, %19 : vector<2x32xf32>
    %23 = arith.addf %21, %22 : vector<2x32xf32>
    %24 = math.tanh %23 : vector<2x32xf32>
    %25 = arith.mulf %20, %24 : vector<2x32xf32>
    %c0_12 = arith.constant 0 : index
    %c0_13 = arith.constant 0 : index
    %c0_14 = arith.constant 0 : index
    %26 = vector.load %arg10[%c0_12, %c0_13, %c0_14] : memref<2x2x32xf32, #tpu.memory_space<vmem>>, vector<1x2x32xf32>
    %27 = vector.shape_cast %26 : vector<1x2x32xf32> to vector<2x32xf32>
    %28 = vector.shape_cast %25 : vector<2x32xf32> to vector<1x2x32xf32>
    tpu.vector_store %arg10[%c0_12, %c0_13, %c0_14], %28 {strides = array<i32>} : memref<2x2x32xf32, #tpu.memory_space<vmem>>, vector<1x2x32xf32>,
    %c0_15 = arith.constant 0 : index
    %c0_16 = arith.constant 0 : index
    %c0_17 = arith.constant 0 : index
    %29 = vector.load %arg11[%c0_15, %c0_16, %c0_17] : memref<2x2x32xf32, #tpu.memory_space<vmem>>, vector<1x2x32xf32>
    %30 = vector.shape_cast %29 : vector<1x2x32xf32> to vector<2x32xf32>
    %31 = vector.shape_cast %23 : vector<2x32xf32> to vector<1x2x32xf32>
    tpu.vector_store %arg11[%c0_15, %c0_16, %c0_17], %31 {strides = array<i32>} : memref<2x2x32xf32, #tpu.memory_space<vmem>>, vector<1x2x32xf32>,
    %c0_18 = arith.constant 0 : index
    %c0_19 = arith.constant 0 : index
    %32 = vector.load %arg5[%c0_18, %c0_19] : memref<64x128xf32, #tpu.memory_space<vmem>>, vector<64x128xf32>
    %c0_20 = arith.constant 0 : index
    %c0_21 = arith.constant 0 : index
    %33 = vector.load %arg6[%c0_20, %c0_21] : memref<1x128xf32, #tpu.memory_space<vmem>>, vector<1x128xf32>
    %c1 = arith.constant 1 : index
    %c0_22 = arith.constant 0 : index
    %c0_23 = arith.constant 0 : index
    %34 = vector.load %arg1[%c1, %c0_22, %c0_23] : memref<2x2x32xf32, #tpu.memory_space<vmem>>, vector<1x2x32xf32>
    %35 = vector.shape_cast %34 : vector<1x2x32xf32> to vector<2x32xf32>
    %c1_24 = arith.constant 1 : index
    %c0_25 = arith.constant 0 : index
    %c0_26 = arith.constant 0 : index
    %36 = vector.load %arg2[%c1_24, %c0_25, %c0_26] : memref<2x2x32xf32, #tpu.memory_space<vmem>>, vector<1x2x32xf32>
    %37 = vector.shape_cast %36 : vector<1x2x32xf32> to vector<2x32xf32>
    %38 = tpu.concatenate %25, %35 in 1 : vector<2x32xf32>, vector<2x32xf32> -> vector<2x64xf32>
    %cst_27 = arith.constant dense<0.000000e+00> : vector<2x128xf32>
    %39 = tpu.matmul %38, %32, %cst_27 {dimension_numbers = #tpu.dot_dimension_numbers<[1], [0], [0], [1], [0, 0, 1, 1], [], []>} : vector<2x64xf32>, vector<64x128xf32>, vector<2x128xf32> -> vector<2x128xf32>
    %40 = vector.broadcast %33 : vector<1x128xf32> to vector<2x128xf32>
    %41 = arith.addf %39, %40 : vector<2x128xf32>
    %42 = arith.negf %41 : vector<2x128xf32>
    %43 = math.exp %42 : vector<2x128xf32>
    %cst_28 = arith.constant 1.000000e+00 : f32
    %44 = vector.broadcast %cst_28 : f32 to vector<2x128xf32>
    %45 = arith.addf %44, %43 : vector<2x128xf32>
    %46 = arith.divf %44, %45 : vector<2x128xf32>
    %47 = math.tanh %41 : vector<2x128xf32>
    %48 = vector.extract_strided_slice %46 {offsets = [0, 0], sizes = [2, 32], strides = [1, 1]} : vector<2x128xf32> to vector<2x32xf32>
    %49 = vector.extract_strided_slice %46 {offsets = [0, 32], sizes = [2, 32], strides = [1, 1]} : vector<2x128xf32> to vector<2x32xf32>
    %50 = vector.extract_strided_slice %47 {offsets = [0, 64], sizes = [2, 32], strides = [1, 1]} : vector<2x128xf32> to vector<2x32xf32>
    %51 = vector.extract_strided_slice %46 {offsets = [0, 96], sizes = [2, 32], strides = [1, 1]} : vector<2x128xf32> to vector<2x32xf32>
    %52 = arith.mulf %49, %37 : vector<2x32xf32>
    %53 = arith.mulf %48, %50 : vector<2x32xf32>
    %54 = arith.addf %52, %53 : vector<2x32xf32>
    %55 = math.tanh %54 : vector<2x32xf32>
    %56 = arith.mulf %51, %55 : vector<2x32xf32>
    %c1_29 = arith.constant 1 : index
    %c0_30 = arith.constant 0 : index
    %c0_31 = arith.constant 0 : index
    %57 = vector.load %arg10[%c1_29, %c0_30, %c0_31] : memref<2x2x32xf32, #tpu.memory_space<vmem>>, vector<1x2x32xf32>
    %58 = vector.shape_cast %57 : vector<1x2x32xf32> to vector<2x32xf32>
    %59 = vector.shape_cast %56 : vector<2x32xf32> to vector<1x2x32xf32>
    tpu.vector_store %arg10[%c1_29, %c0_30, %c0_31], %59 {strides = array<i32>} : memref<2x2x32xf32, #tpu.memory_space<vmem>>, vector<1x2x32xf32>,
    %c1_32 = arith.constant 1 : index
    %c0_33 = arith.constant 0 : index
    %c0_34 = arith.constant 0 : index
    %60 = vector.load %arg11[%c1_32, %c0_33, %c0_34] : memref<2x2x32xf32, #tpu.memory_space<vmem>>, vector<1x2x32xf32>
    %61 = vector.shape_cast %60 : vector<1x2x32xf32> to vector<2x32xf32>
    %62 = vector.shape_cast %54 : vector<2x32xf32> to vector<1x2x32xf32>
    tpu.vector_store %arg11[%c1_32, %c0_33, %c0_34], %62 {strides = array<i32>} : memref<2x2x32xf32, #tpu.memory_space<vmem>>, vector<1x2x32xf32>,
    %c0_35 = arith.constant 0 : index
    %c0_36 = arith.constant 0 : index
    %63 = vector.load %arg7[%c0_35, %c0_36] : memref<32x8xf32, #tpu.memory_space<vmem>>, vector<32x8xf32>
    %cst_37 = arith.constant dense<0.000000e+00> : vector<2x8xf32>
    %64 = tpu.matmul %56, %63, %cst_37 {dimension_numbers = #tpu.dot_dimension_numbers<[1], [0], [0], [1], [0, 0, 1, 1], [], []>} : vector<2x32xf32>, vector<32x8xf32>, vector<2x8xf32> -> vector<2x8xf32>
    %c0_38 = arith.constant 0 : index
    %c0_39 = arith.constant 0 : index
    %65 = vector.load %arg8[%c0_38, %c0_39] : memref<1x8xf32, #tpu.memory_space<vmem>>, vector<1x8xf32>
    %66 = vector.broadcast %65 : vector<1x8xf32> to vector<2x8xf32>
    %67 = arith.addf %64, %66 : vector<2x8xf32>
    %c0_40 = arith.constant 0 : index
    %c0_41 = arith.constant 0 : index
    %68 = vector.load %arg9[%c0_40, %c0_41] : memref<2x8xf32, #tpu.memory_space<vmem>>, vector<2x8xf32>
    tpu.vector_store %arg9[%c0_40, %c0_41], %67 {strides = array<i32>} : memref<2x8xf32, #tpu.memory_space<vmem>>, vector<2x8xf32>,
    return
  }
}

</mosaic_0001>

<bundles_post_ra>
// kernel: decoder_forward.1
= control target key start
LH: loop header
LB: loop body
LE: loop exit
PB: predicated region body
PF: predicated region fallthrough
CT: control target
= control target key end

     0   :  { %17 = vsyncpa [#allocation3], 0  ;;  %s1097_s0 = inlined_call_operand.vmem [shape: f32[2,8], index: 0, kind: input, shape index: {}]   ;;  %s1098_s1 = inlined_call_operand.hbm [shape: f32[2,2,32], index: 1, kind: input, shape index: {}, may-alias: {1,10}]   ;;  %s1099_s2 = inlined_call_operand.hbm [shape: f32[2,2,32], index: 2, kind: input, shape index: {}, may-alias: {2,11}]   ;;  %s1100_s3 = inlined_call_operand.hbm [shape: f32[40,128], index: 3, kind: input, shape index: {}]   ;;  %s1101_s4 = inlined_call_operand.hbm [shape: f32[1,128], index: 4, kind: input, shape index: {}]   ;;  %s1102_s5 = inlined_call_operand.vmem [shape: f32[64,128], index: 5, kind: input, shape index: {}]   ;;  %s1103_s6 = inlined_call_operand.hbm [shape: f32[1,128], index: 6, kind: input, shape index: {}]   ;;  %s1104_s7 = inlined_call_operand.vmem [shape: f32[32,8], index: 7, kind: input, shape index: {}]   ;;  %s1105_s8 = inlined_call_operand.vmem [shape: f32[1,8], index: 8, kind: input, shape index: {}]   ;;  %s1106_s9 = inlined_call_operand.hbm [shape: f32[2,8], index: 9, kind: output, shape index: {0}]   ;;  %s1107_s10 = inlined_call_operand.hbm [shape: f32[2,2,32], index: 10, kind: output, shape index: {1}, may-alias: {1,10}]   ;;  %s1108_s11 = inlined_call_operand.hbm [shape: f32[2,2,32], index: 11, kind: output, shape index: {2}, may-alias: {2,11}]  }
   0x1   :  { %18 = vsyncpa [#allocation6], 0 }
   0x2   :  { %19 = vsyncpa [#allocation9], 0 }
   0x3   :  { %20 = vsyncpa [#allocation4], 0 }
   0x4   :  { %21 = vsyncpa [#allocation13], 0  ;;  %s821_s17 = smov [#allocation5]   ;;  %s822_s19 = smov [#allocation8]  }
   0x5   :  { %s41_s18 = sshll.u32 %s821_s17, 4  ;;  %s66_s20 = sshll.u32 %s822_s19, 4  ;;  %s42_s18 = int_to_ptr.vmem [resolvable:$true] %s41_s18  ;;  %s898_s20 = int_to_ptr.vmem [resolvable:$true] %s66_s20 }
   0x6   :  { %s635_s23 = scalar_lea.hbm %s1099_s2, 64 }
   0x7   :  { %p636_p0 = scmp.ne.s32.totalorder %s1099_s2, %s635_s23  ;;  %p639_p1 = scmp.lt.u32.totalorder %s635_s23, %s1099_s2 }
   0x9   :  { %p641_p2 = pnand %p639_p1, %p636_p0 }
   0xb   :  { %644 = shalt.err (!%p641_p2)
}
   0xc   :  { %s645_s28 = scalar_lea.vmem %s42_s18, 64  ;;  %p650_p4 = scmp.lt.s32.totalorder %s42_s18, %s42_s18 }
   0xd   :  { %p646_p3 = scmp.ne.s32.totalorder %s42_s18, %s645_s28  ;;  %p651_p5 = scmp.lt.s32.totalorder %s645_s28, %s645_s28 }
   0xf   :  { %p652_p6 = por %p651_p5, %p650_p4 }
  0x11   :  { %p653_p7 = pnand %p652_p6, %p646_p3 }
  0x13   :  { %656 = shalt.err (!%p653_p7)
}
  0x14   :  { %s823_s29 = smov 32   ;;  %s824_s30 = smov 2  }
  0x15   :  { %47 = dma.hbm_to_vmem [thread:$0]  %s1099_s2, 64, %s42_s18, [#allocation6], %s823_s29, %s823_s29, %s824_s30  }
  0x16   :  { %s657_s16 = scalar_lea.hbm %s1101_s4, 16 }
  0x17   :  { %p658_p8 = scmp.ne.s32.totalorder %s1101_s4, %s657_s16  ;;  %p661_p9 = scmp.lt.u32.totalorder %s657_s16, %s1101_s4 }
  0x19   :  { %p663_p10 = pnand %p661_p9, %p658_p8 }
  0x1b   :  { %666 = shalt.err (!%p663_p10)
}
  0x1c   :  { %s667_s23 = scalar_lea.vmem %s898_s20, 16  ;;  %s671_s2 = scalar_lea.vmem %s898_s20, 32 }
  0x1d   :  { %p668_p11 = scmp.ne.s32.totalorder %s898_s20, %s667_s23  ;;  %p672_p12 = scmp.lt.s32.totalorder %s898_s20, %s898_s20 }
  0x1e   :  { %p673_p13 = scmp.lt.s32.totalorder %s671_s2, %s667_s23 }
  0x20   :  { %p674_p0 = por %p673_p13, %p672_p12 }
  0x22   :  { %p675_p1 = pnand %p674_p0, %p668_p11 }
  0x24   :  { %678 = shalt.err (!%p675_p1)
}
  0x25   :  { %69 = dma.hbm_to_vmem [thread:$0]  %s1101_s4, 16, %s898_s20, [#allocation9]  }
  0x26   :  { %s825_s25 = smov [#allocation2]   ;;  %s826_s27 = smov [#allocation7]  }
  0x27   :  { %s29_s26 = sshll.u32 %s825_s25, 4  ;;  %s53_s28 = sshll.u32 %s826_s27, 4  ;;  %s30_s26 = int_to_ptr.vmem [resolvable:$true] %s29_s26  ;;  %s933_s28 = int_to_ptr.vmem [resolvable:$true] %s53_s28 }
  0x28   :  { %s679_s14 = scalar_lea.hbm %s1098_s1, 64 }
  0x29   :  { %p680_p2 = scmp.ne.s32.totalorder %s1098_s1, %s679_s14  ;;  %p683_p3 = scmp.lt.u32.totalorder %s679_s14, %s1098_s1 }
  0x2b   :  { %p685_p4 = pnand %p683_p3, %p680_p2 }
  0x2d   :  { %688 = shalt.err (!%p685_p4)
}
  0x2e   :  { %s689_s4 = scalar_lea.vmem %s30_s26, 64  ;;  %p694_p6 = scmp.lt.s32.totalorder %s30_s26, %s30_s26 }
  0x2f   :  { %p690_p5 = scmp.ne.s32.totalorder %s30_s26, %s689_s4  ;;  %p695_p7 = scmp.lt.s32.totalorder %s689_s4, %s689_s4 }
  0x31   :  { %p696_p8 = por %p695_p7, %p694_p6 }
  0x33   :  { %p697_p9 = pnand %p696_p8, %p690_p5 }
  0x35   :  { %700 = shalt.err (!%p697_p9)
}
  0x36   :  { %35 = dma.hbm_to_vmem [thread:$0]  %s1098_s1, 64, %s30_s26, [#allocation3], %s823_s29, %s823_s29, %s824_s30  }
  0x37   :  { %s701_s2 = scalar_lea.hbm %s1100_s3, 640 }
  0x38   :  { %p702_p10 = scmp.ne.s32.totalorder %s1100_s3, %s701_s2  ;;  %p705_p11 = scmp.lt.u32.totalorder %s701_s2, %s1100_s3 }
  0x3a   :  { %p707_p12 = pnand %p705_p11, %p702_p10 }
  0x3c   :  { %710 = shalt.err (!%p707_p12)
}
  0x3d   :  { %s711_s12 = scalar_lea.vmem %s933_s28, 640  ;;  %p716_p0 = scmp.lt.s32.totalorder %s933_s28, %s933_s28 }
  0x3e   :  { %p712_p13 = scmp.ne.s32.totalorder %s933_s28, %s711_s12  ;;  %p717_p1 = scmp.lt.s32.totalorder %s711_s12, %s711_s12 }
  0x40   :  { %p718_p2 = por %p717_p1, %p716_p0 }
  0x42   :  { %p719_p3 = pnand %p718_p2, %p712_p13 }
  0x44   :  { %722 = shalt.err (!%p719_p3)
}
  0x45   :  { %s827_s1 = smov 128   ;;  %s828_s26 = smov 8  }
  0x46   :  { %59 = dma.hbm_to_vmem [thread:$0]  %s1100_s3, 640, %s933_s28, [#allocation6], %s827_s1, %s827_s1, %s828_s26  }
  0x47   :  { %s829_s15 = smov [#allocation10]   ;;  %s723_s4 = scalar_lea.hbm %s1103_s6, 16 }
  0x48   :  { %s78_s16 = sshll.u32 %s829_s15, 4  ;;  %p724_p4 = scmp.ne.s32.totalorder %s1103_s6, %s723_s4  ;;  %s79_s16 = int_to_ptr.vmem [resolvable:$true] %s78_s16 }
  0x49   :  { %p727_p5 = scmp.lt.u32.totalorder %s723_s4, %s1103_s6 }
  0x4b   :  { %p729_p6 = pnand %p727_p5, %p724_p4 }
  0x4d   :  { %732 = shalt.err (!%p729_p6)
}
  0x4e   :  { %s733_s2 = scalar_lea.vmem %s79_s16, 16  ;;  %s737_s3 = scalar_lea.vmem %s79_s16, 32 }
  0x4f   :  { %p734_p7 = scmp.ne.s32.totalorder %s79_s16, %s733_s2  ;;  %p738_p8 = scmp.lt.s32.totalorder %s79_s16, %s79_s16 }
  0x50   :  { %p739_p9 = scmp.lt.s32.totalorder %s737_s3, %s733_s2 }
  0x52   :  { %p740_p10 = por %p739_p9, %p738_p8 }
  0x54   :  { %p741_p11 = pnand %p740_p10, %p734_p7 }
  0x56   :  { %744 = shalt.err (!%p741_p11)
}
  0x57   :  { %81 = dma.hbm_to_vmem [thread:$0]  %s1103_s6, 16, %s79_s16, [#allocation9]  }
  0x58   :  { %811 = dma.done.wait [#allocation3], 64  }
  0x59   :  { %812 = vsyncadd [#allocation3], 4294967232 }
  0x5a   :  { %813 = dma.done.wait [#allocation6], 704  }
  0x5b   :  { %814 = vsyncadd [#allocation6], 4294966592 }
  0x5c   :  { %815 = dma.done.wait [#allocation9], 32  }
  0x5d   :  { %816 = vsyncadd [#allocation9], 4294967264  ;;  %v830_v0 = vmov 0.0|0.0   ;;  %vm831_vm0 = vmmov 0   ;;  %v832_v1 = vmov 0.0   ;;  %v102_v3 = vld [vmem:[#allocation7] sm:$0xff] }
  0x5e   :  { %578 = vmatprep.subr.bf16.mxu0 %v830_v0  ;;  %545 = vmatprep.mubr.msk.f32.mxu0 %vm831_vm0, %v832_v1  ;;  %v108_v2 = vld [vmem:[#allocation2] sm:$0x3]  ;;  %v103_v4 = vld [vmem:[#allocation7 + $0x8] sm:$0xff]  ;;  %v104_v6 = vld [vmem:[#allocation7 + $0x10] sm:$0xff]  ;;  %vm114_vm1 = vcmask 64512   ;;  %vm122_vm2 = vcmask 326656  }
  0x5f   :  { %584 = vmatprep.subr.bf16.mxu1 %v830_v0  ;;  %564 = vmatprep.mubr.msk.f32.mxu1 %vm831_vm0, %v832_v1  ;;  %v579_v5 = vpack.c.bf16 %v103_v4, %v102_v3  ;;  %v105_v7 = vld [vmem:[#allocation7 + $0x18] sm:$0xff]  ;;  %v106_v10 = vld [vmem:[#allocation7 + $0x20] sm:$0xff]  ;;  %v101_v11 = vld [vmem:[%s1097_s0] sm:$0x3]  ;;  %s833_s25 = smov 64   ;;  %vm228_vm3 = vcmask 254976  }
  0x60   :  { %111 = vrot.lane.b32.xlu0 %v108_v2, %s828_s26  ;;  %v109_v8 = vld [vmem:[#allocation5] sm:$0x3]  ;;  %v582_v9 = vpack.c.bf16 %v105_v7, %v104_v6  ;;  %v507_v14 = vld [vmem:[#allocation8] ss:$0 sm:$0xff]  ;;  %v235_v29 = vld [vmem:[%s1102_s5] sm:$0xff]  ;;  %vm252_vm4 = vcmask 261120  }
  0x61   :  { %580 = vmatpush3.bf16.msra.mxu0 %v579_v5  ;;  %204 = vrot.lane.b32.xlu1 %v109_v8, %s823_s29  ;;  %v236_v30 = vld [vmem:[%s1102_s5 + $0x8] sm:$0xff]  ;;  %v237_v31 = vld [vmem:[%s1102_s5 + $0x10] sm:$0xff]  ;;  %v238_v33 = vld [vmem:[%s1102_s5 + $0x18] sm:$0xff]  ;;  %vm260_vm5 = vcmask 523264   ;;  %s834_s27 = smov 96  }
  0x62   :  { %581 = vmatprep.subr.bf16.mxu0 %v830_v0  ;;  %v585_v32 = vpack.c.bf16 %v236_v30, %v235_v29  ;;  %v588_v34 = vpack.c.bf16 %v238_v33, %v237_v31  ;;  %v239_v35 = vld [vmem:[%s1102_s5 + $0x20] sm:$0xff]  ;;  %v240_v36 = vld [vmem:[%s1102_s5 + $0x28] sm:$0xff]  ;;  %v241_v38 = vld [vmem:[%s1102_s5 + $0x30] sm:$0xff] }
  0x63   :  { %v591_v37 = vpack.c.bf16 %v240_v36, %v239_v35  ;;  %v242_v39 = vld [vmem:[%s1102_s5 + $0x38] sm:$0xff]  ;;  %v245_v42 = vld [vmem:[#allocation2 + $0x2] sm:$0x3]  ;;  %v247_v43 = vld [vmem:[#allocation5 + $0x2] sm:$0x3] }
  0x64   :  { %586 = vmatpush3.bf16.msra.mxu1 %v585_v32  ;;  %v594_v41 = vpack.c.bf16 %v242_v39, %v241_v38  ;;  %v510_v49 = vld [vmem:[#allocation10] ss:$0 sm:$0xff]  ;;  %v375_v2 = vld [vmem:[%s1104_s7 + $0x8] sm:$0xff]  ;;  %v376_v3 = vld [vmem:[%s1104_s7 + $0x10] sm:$0xff] }
  0x65   :  { %583 = vmatpush3.bf16.msra.mxu0 %v582_v9  ;;  %587 = vmatprep.subr.bf16.mxu1 %v830_v0  ;;  %v377_v5 = vld [vmem:[%s1104_s7 + $0x18] sm:$0xff] }
  0x66   :  { %543 = vmatprep.subr.mxu0 %v832_v1  ;;  %v600_v6 = vpack.c.bf16 %v377_v5, %v376_v3 }
  0x68   :  { %589 = vmatpush3.bf16.msra.mxu1 %v588_v34 }
  0x69   :  { %544 = vmatpush3.msra.mxu0 %v106_v10  ;;  %590 = vmatprep.subr.bf16.mxu1 %v830_v0 }
  0x6a   :  { %596 = vmatprep.subr.bf16.mxu0 %v830_v0 }
  0x6c   :  { %592 = vmatpush3.bf16.msra.mxu1 %v591_v37 }
  0x6d   :  { %593 = vmatprep.subr.bf16.mxu1 %v830_v0 }
  0x70   :  { %595 = vmatpush3.bf16.msra.mxu1 %v594_v41 }
  0xd2   :  { %v112_v12 = vpop.permute.xlu0 %111 }
  0xd3   :  { %v115_v13 = vsel %vm114_vm1, %v101_v11, %v112_v12  ;;  %v205_v25 = vpop.permute.xlu1 %204 }
  0xd4   :  { %546 = vmatmul.mubr.msk.f32.vlgmr.msra.gmra.mrb[0].mxu0 %vm122_vm2, %v115_v13 }
  0xd5   :  { %575 = vmatprep.mubr.msk.f32.mxu0 %vm831_vm0, %v832_v1  ;;  %v374_v1 = vld [vmem:[%s1104_s7] sm:$0xff]  ;;  %s835_s7 = smov [#allocation12]  }
  0xd6   :  { %v597_v4 = vpack.c.bf16 %v375_v2, %v374_v1 }
  0xd8   :  { %598 = vmatpush3.bf16.msra.mxu0 %v597_v4 }
  0xd9   :  { %599 = vmatprep.subr.bf16.mxu0 %v830_v0 }
  0xdc   :  { %601 = vmatpush3.bf16.msra.mxu0 %v600_v6 }
 0x1a7   :  { %v192_v15 = vpop.f32.mrb[0].mxu0 }
 0x1a8   :  { %v193_v16 = vadd.f32 %v507_v14, %v192_v15  ;;  %v547_v17 = vpop.f32.mrb[1].mxu0 }
 0x1aa   :  { %619 = vtanh.f32 %v193_v16  ;;  %v509_v19 = vmul.f32 -1.442695, %v193_v16 }
 0x1ac   :  { %621 = vpow2.f32 %v509_v19 }
 0x1b4   :  { %v620_v18 = vpop.eup %619 }
 0x1b5   :  { %209 = vrot.lane.b32.xlu0 %v620_v18, %s833_s25 }
 0x1b6   :  { %v622_v20 = vpop.eup %621 }
 0x1b7   :  { %v199_v21 = vadd.f32 1.0, %v622_v20 }
 0x1b9   :  { %623 = vrcp.f32 %v199_v21 }
 0x1c3   :  { %v624_v22 = vpop.eup %623 }
 0x1c4   :  { %v207_v26 = vmul.f32 %v624_v22, %v205_v25 }
 0x227   :  { %v210_v23 = vpop.permute.xlu0 %209 }
 0x228   :  { %v212_v24 = vmul.f32 %v624_v22, %v210_v23 }
 0x22a   :  { %214 = vrot.lane.b32.xlu1 %v212_v24, %s823_s29 }
 0x29c   :  { %v215_v27 = vpop.permute.xlu1 %214 }
 0x29d   :  { %v994_v28 = vadd.f32 %v215_v27, %v207_v26 }
 0x29f   :  { %625 = vtanh.f32 %v994_v28 }
 0x2a9   :  { %v626_v40 = vpop.eup %625 }
 0x2aa   :  { %220 = vrot.lane.b32.xlu0 %v626_v40, %s833_s25 }
 0x2ae   :  { %249 = vrot.lane.b32.xlu0 %v245_v42, %s823_s29 }
 0x2b2   :  { %342 = vrot.lane.b32.xlu0 %v247_v43, %s823_s29 }
 0x31c   :  { %v221_v44 = vpop.permute.xlu0 %220 }
 0x31d   :  { %v223_v45 = vmul.f32 %v624_v22, %v221_v44 }
 0x31f   :  { %225 = vrot.lane.b32.xlu1 %v223_v45, %s823_s29 }
 0x320   :  { %v250_v46 = vpop.permute.xlu0 %249 }
 0x324   :  { %v343_v60 = vpop.permute.xlu0 %342 }
 0x391   :  { %v226_v47 = vpop.permute.xlu1 %225 }
 0x392   :  { %229 = vst.msk [vmem:[#allocation12] sm:$0x3] %vm228_vm3, %v226_v47  ;;  %v253_v48 = vsel %vm252_vm4, %v226_v47, %v250_v46 }
 0x393   :  { %565 = vmatmul.mubr.msk.f32.vlgmr.msra.gmra.mrb[0].mxu1 %vm260_vm5, %v253_v48 }
 0x466   :  { %v330_v50 = vpop.f32.mrb[0].mxu1 }
 0x467   :  { %v331_v51 = vadd.f32 %v510_v49, %v330_v50  ;;  %v566_v52 = vpop.f32.mrb[1].mxu1 }
 0x469   :  { %627 = vtanh.f32 %v331_v51  ;;  %v512_v54 = vmul.f32 -1.442695, %v331_v51 }
 0x46b   :  { %629 = vpow2.f32 %v512_v54 }
 0x473   :  { %v628_v53 = vpop.eup %627 }
 0x474   :  { %347 = vrot.lane.b32.xlu1 %v628_v53, %s833_s25 }
 0x475   :  { %v630_v55 = vpop.eup %629 }
 0x476   :  { %v337_v56 = vadd.f32 1.0, %v630_v55 }
 0x478   :  { %631 = vrcp.f32 %v337_v56 }
 0x482   :  { %v632_v57 = vpop.eup %631 }
 0x483   :  { %v345_v61 = vmul.f32 %v632_v57, %v343_v60 }
 0x4e6   :  { %v348_v58 = vpop.permute.xlu1 %347 }
 0x4e7   :  { %v350_v59 = vmul.f32 %v632_v57, %v348_v58 }
 0x4e9   :  { %352 = vrot.lane.b32.xlu1 %v350_v59, %s823_s29 }
 0x55b   :  { %v353_v62 = vpop.permute.xlu1 %352 }
 0x55c   :  { %v355_v63 = vadd.f32 %v353_v62, %v345_v61 }
 0x55e   :  { %633 = vtanh.f32 %v355_v63 }
 0x568   :  { %v634_v7 = vpop.eup %633 }
 0x569   :  { %358 = vrot.lane.b32.xlu0 %v634_v7, %s833_s25  ;;  %s474_s25 = sshll.u32 %s835_s7, 4  ;;  %s475_s25 = int_to_ptr.vmem [resolvable:$true] %s474_s25 }
 0x56a   :  { %s745_s12 = scalar_lea.vmem %s475_s25, 64  ;;  %p750_p13 = scmp.lt.s32.totalorder %s475_s25, %s475_s25 }
 0x56b   :  { %p746_p12 = scmp.ne.s32.totalorder %s475_s25, %s745_s12  ;;  %p751_p0 = scmp.lt.s32.totalorder %s745_s12, %s745_s12 }
 0x56d   :  { %231 = vrot.lane.b32.xlu0 %v994_v28, %s834_s27  ;;  %p752_p1 = por %p751_p0, %p750_p13 }
 0x56f   :  { %p753_p2 = pnand %p752_p1, %p746_p12 }
 0x5db   :  { %v359_v8 = vpop.permute.xlu0 %358 }
 0x5dc   :  { %v361_v9 = vmul.f32 %v632_v57, %v359_v8 }
 0x5de   :  { %363 = vrot.lane.b32.xlu1 %v361_v9, %s823_s29 }
 0x5df   :  { %v232_v10 = vpop.permute.xlu0 %231 }
 0x5e0   :  { %234 = vst.msk [vmem:[#allocation14] sm:$0x3] %vm228_vm3, %v232_v10 }
 0x5e2   :  { %369 = vrot.lane.b32.xlu1 %v355_v63, %s834_s27 }
 0x650   :  { %v364_v11 = vpop.permute.xlu1 %363 }
 0x651   :  { %367 = vst.msk [vmem:[#allocation12 + $0x2] sm:$0x3] %vm228_vm3, %v364_v11  ;;  %576 = vmatmul.mubr.msk.f32.vlgmr.msra.gmra.mrb[2].mxu0 %vm252_vm4, %v364_v11 }
 0x654   :  { %v370_v0 = vpop.permute.xlu1 %369 }
 0x655   :  { %373 = vst.msk [vmem:[#allocation14 + $0x2] sm:$0x3] %vm228_vm3, %v370_v0 }
 0x656   :  { %756 = shalt.err (!%p753_p2)
}
 0x657   :  { %s757_s13 = scalar_lea.hbm %s1107_s10, 64 }
 0x658   :  { %p758_p3 = scmp.ne.s32.totalorder %s1107_s10, %s757_s13  ;;  %p761_p4 = scmp.lt.u32.totalorder %s757_s13, %s1107_s10 }
 0x65a   :  { %p763_p5 = pnand %p761_p4, %p758_p3 }
 0x65c   :  { %766 = shalt.err (!%p763_p5)
}
 0x65d   :  { %480 = dma.vmem_to_hbm [thread:$0]  %s475_s25, 64, %s1107_s10, [#allocation13], %s823_s29, %s823_s29, %s824_s30  }
 0x65e   :  { %s836_s20 = smov [#allocation14]  }
 0x65f   :  { %s486_s21 = sshll.u32 %s836_s20, 4  ;;  %s487_s21 = int_to_ptr.vmem [resolvable:$true] %s486_s21 }
 0x660   :  { %s767_s22 = scalar_lea.vmem %s487_s21, 64  ;;  %p772_p7 = scmp.lt.s32.totalorder %s487_s21, %s487_s21 }
 0x661   :  { %p768_p6 = scmp.ne.s32.totalorder %s487_s21, %s767_s22  ;;  %p773_p8 = scmp.lt.s32.totalorder %s767_s22, %s767_s22 }
 0x663   :  { %p774_p9 = por %p773_p8, %p772_p7 }
 0x665   :  { %p775_p10 = pnand %p774_p9, %p768_p6 }
 0x667   :  { %778 = shalt.err (!%p775_p10)
}
 0x668   :  { %s779_s2 = scalar_lea.hbm %s1108_s11, 64 }
 0x669   :  { %p780_p11 = scmp.ne.s32.totalorder %s1108_s11, %s779_s2  ;;  %p783_p12 = scmp.lt.u32.totalorder %s779_s2, %s1108_s11 }
 0x66b   :  { %p785_p13 = pnand %p783_p12, %p780_p11 }
 0x66d   :  { %788 = shalt.err (!%p785_p13)
}
 0x66e   :  { %492 = dma.vmem_to_hbm [thread:$0]  %s487_s21, 64, %s1108_s11, [#allocation13], %s823_s29, %s823_s29, %s824_s30   ;;  %vm457_vm6 = vcmask 58368  }
 0x66f   :  { %v513_v12 = vld [vmem:[%s1105_s8] ss:$0 sm:$0xff]  ;;  %s837_s7 = smov [#allocation11]  }
 0x670   :  { %s465_s25 = sshll.u32 %s837_s7, 4  ;;  %s466_s25 = int_to_ptr.vmem [resolvable:$true] %s465_s25 }
 0x671   :  { %s789_s12 = scalar_lea.vmem %s466_s25, 32  ;;  %p794_p1 = scmp.lt.s32.totalorder %s466_s25, %s466_s25 }
 0x672   :  { %p790_p0 = scmp.ne.s32.totalorder %s466_s25, %s789_s12  ;;  %p795_p2 = scmp.lt.s32.totalorder %s789_s12, %s789_s12 }
 0x674   :  { %p796_p3 = por %p795_p2, %p794_p1 }
 0x676   :  { %p797_p4 = pnand %p796_p3, %p790_p0 }
 0x724   :  { %v453_v13 = vpop.f32.mrb[2].mxu0 }
 0x725   :  { %v454_v14 = vadd.f32 %v513_v12, %v453_v13  ;;  %v577_v15 = vpop.f32.mrb[3].mxu0 }
 0x727   :  { %458 = vst.msk [vmem:[#allocation11] sm:$0x3] %vm457_vm6, %v454_v14 }
 0x728   :  { %800 = shalt.err (!%p797_p4)
}
 0x729   :  { %s801_s30 = scalar_lea.hbm %s1106_s9, 32 }
 0x72a   :  { %p802_p5 = scmp.ne.s32.totalorder %s1106_s9, %s801_s30  ;;  %p805_p6 = scmp.lt.u32.totalorder %s801_s30, %s1106_s9 }
 0x72c   :  { %p807_p7 = pnand %p805_p6, %p802_p5 }
 0x72e   :  { %810 = shalt.err (!%p807_p7)
}
 0x72f   :  { %468 = dma.vmem_to_hbm [thread:$0]  %s466_s25, 32, %s1106_s9, [#allocation4]  }
 0x730   :  { %817 = dma.done.wait [#allocation4], 32  }
 0x731   :  { %818 = vsyncadd [#allocation4], 4294967264 }
 0x732   :  { %819 = dma.done.wait [#allocation13], 128  }
 0x733   :  { %820 = vsyncadd [#allocation13], 4294967168 }
 0x734   :  { %502 = vsyncpa [#allocation3], 1 }
 0x735   :  { %503 = vsyncpa [#allocation6], 1 }
 0x736   :  { %504 = vsyncpa [#allocation9], 1 }
 0x737   :  { %505 = vsyncpa [#allocation4], 1 }
 0x738   :  { %506 = vsyncpa [#allocation13], 1 }

</bundles_post_ra>
